<compile_context>
chip_gen: v5e
topology: v5e:2x2
jax: 0.10.0
libtpu: 0.0.40
codegen_flags: <defaults>
</compile_context>

<pallas_src>
import functools

import jax
import jax.numpy as jnp
from jax.experimental import pallas as pl
from jax.experimental.pallas import tpu as pltpu

LANE = 128      # vreg lane width
SUBLANE = 8     # f32 sublane count


def _round_up(n, m):
    return ((n + m - 1) // m) * m


def _pad2(a, rows, cols, dtype):
    """Zero-pad a 2-D array to (rows, cols) and cast to dtype."""
    out = jnp.zeros((rows, cols), dtype)
    return out.at[: a.shape[0], : a.shape[1]].set(a.astype(dtype))


def dqn1_kernel(x_ref, w1_ref, b1_ref, w2_ref, b2_ref, w3_ref, b3_ref, out_ref):
    # Matmuls: bf16 operands on the MXU, f32 accumulation.
    # Bias add + tanh: f32 on VPU/EUP (v5e-safe — no bf16 VPU/EUP there).
    x = x_ref[...]                                                 # (TB, D) bf16
    h1 = jnp.dot(x, w1_ref[...], preferred_element_type=jnp.float32) + b1_ref[...]
    h1 = jnp.tanh(h1)
    h2 = jnp.dot(h1.astype(jnp.bfloat16), w2_ref[...],
                 preferred_element_type=jnp.float32) + b2_ref[...]
    h2 = jnp.tanh(h2)
    y = jnp.dot(h2.astype(jnp.bfloat16), w3_ref[...],
                preferred_element_type=jnp.float32) + b3_ref[...]
    out_ref[...] = y                                               # lane-dense f32 store


@jax.jit
def dqn1_forward(x, params):
    """x: (B, n_observations) float32. params: dict of w1,b1,w2,b2,w3,b3 (f32)."""
    w1, b1 = params["w1"], params["b1"]
    w2, b2 = params["w2"], params["b2"]
    w3, b3 = params["w3"], params["b3"]

    B, n_obs = x.shape
    H = w1.shape[1]
    n_actions = w3.shape[1]

    # Lane-dense padded feature dims; sublane-padded batch with a batch grid.
    D = _round_up(n_obs, LANE)
    Hp = _round_up(H, LANE)
    Ap = _round_up(n_actions, LANE)
    tile_b = min(512, _round_up(B, SUBLANE))
    Bp = _round_up(B, tile_b)
    grid = (Bp // tile_b,)

    # Zero padding keeps the valid columns exact: padded input rows / weight
    # rows-cols / bias entries are zero, and tanh(0) = 0 propagates zeros.
    xp = _pad2(x, Bp, D, jnp.bfloat16)
    w1p = _pad2(w1, D, Hp, jnp.bfloat16)
    w2p = _pad2(w2, Hp, Hp, jnp.bfloat16)
    w3p = _pad2(w3, Hp, Ap, jnp.bfloat16)
    b1p = _pad2(b1, 1, Hp, jnp.float32)
    b2p = _pad2(b2, 1, Hp, jnp.float32)
    b3p = _pad2(b3, 1, Ap, jnp.float32)

    const_spec = lambda a: pl.BlockSpec(a.shape, lambda i: (0, 0))

    flops = 2 * Bp * (D * Hp + Hp * Hp + Hp * Ap)
    transcendentals = 2 * Bp * Hp
    bytes_accessed = (xp.size * 2 + w1p.size * 2 + w2p.size * 2 + w3p.size * 2
                      + b1p.size * 4 + b2p.size * 4 + b3p.size * 4
                      + Bp * Ap * 4)

    out = pl.pallas_call(
        dqn1_kernel,
        out_shape=jax.ShapeDtypeStruct((Bp, Ap), jnp.float32),
        grid=grid,
        in_specs=[
            pl.BlockSpec((tile_b, D), lambda i: (i, 0)),   # x: tiled over batch
            const_spec(w1p), const_spec(b1p),              # weights/biases resident
            const_spec(w2p), const_spec(b2p),
            const_spec(w3p), const_spec(b3p),
        ],
        out_specs=pl.BlockSpec((tile_b, Ap), lambda i: (i, 0)),
        compiler_params=pltpu.CompilerParams(
            dimension_semantics=("parallel",)),
        cost_estimate=pl.CostEstimate(
            flops=flops,
            transcendentals=transcendentals,
            bytes_accessed=bytes_accessed),
    )(xp, w1p, b1p, w2p, b2p, w3p, b3p)

    return out[:B, :n_actions]


def init_dqn1_params(key, num_nodes, n_observations, n_actions):
    """nn.Linear-style U(-1/sqrt(fan_in), 1/sqrt(fan_in)) init.

    Weights are (in_features, out_features) — transposed vs. torch's (out, in).
    """
    keys = jax.random.split(key, 6)

    def linear(kw, kb, fan_in, fan_out):
        bound = 1.0 / jnp.sqrt(jnp.float32(fan_in))
        w = jax.random.uniform(kw, (fan_in, fan_out), jnp.float32, -bound, bound)
        b = jax.random.uniform(kb, (1, fan_out), jnp.float32, -bound, bound)
        return w, b

    w1, b1 = linear(keys[0], keys[1], n_observations, num_nodes)
    w2, b2 = linear(keys[2], keys[3], num_nodes, num_nodes)
    w3, b3 = linear(keys[4], keys[5], num_nodes, n_actions)
    return {"w1": w1, "b1": b1, "w2": w2, "b2": b2, "w3": w3, "b3": b3}


def dqn1_reference(x, params, matmul_dtype=jnp.float32):
    def mm(a, w):
        return jnp.dot(a.astype(matmul_dtype), w.astype(matmul_dtype),
                       preferred_element_type=jnp.float32)

    h1 = jnp.tanh(mm(x, params["w1"]) + params["b1"])
    h2 = jnp.tanh(mm(h1, params["w2"]) + params["b2"])
    return mm(h2, params["w3"]) + params["b3"]


if __name__ == "__main__":
    # Small shapes consistent with the module's forward.
    batch = 2
    n_observations = 8
    num_nodes = 32
    n_actions = 4

    key = jax.random.PRNGKey(0)
    k_params, k_x = jax.random.split(key)
    params = init_dqn1_params(k_params, num_nodes, n_observations, n_actions)
    x = jax.random.normal(k_x, (batch, n_observations), jnp.float32)

    out = jax.block_until_ready(dqn1_forward(x, params))
    assert out.shape == (batch, n_actions)

    # Strict check vs. a JAX reference using the same bf16-matmul / f32-accum path.
    ref_bf16 = dqn1_reference(x, params, matmul_dtype=jnp.bfloat16)
    assert jnp.allclose(out, ref_bf16, atol=1e-4, rtol=1e-4), (
        jnp.max(jnp.abs(out - ref_bf16)))

    # Loose sanity check vs. the pure-f32 math reference.
    ref_f32 = dqn1_reference(x, params, matmul_dtype=jnp.float32)
    assert jnp.allclose(out, ref_f32, atol=5e-2, rtol=5e-2), (
        jnp.max(jnp.abs(out - ref_f32)))

    print("KERNEL_OK")
</pallas_src>

<mosaic_0001>
module attributes {stable_mosaic.version = 11 : i64} {
  func.func @dqn1_kernel(%arg0: i32, %arg1: memref<8x128xbf16, #tpu.memory_space<vmem>>, %arg2: memref<128x128xbf16, #tpu.memory_space<vmem>>, %arg3: memref<1x128xf32, #tpu.memory_space<vmem>>, %arg4: memref<128x128xbf16, #tpu.memory_space<vmem>>, %arg5: memref<1x128xf32, #tpu.memory_space<vmem>>, %arg6: memref<128x128xbf16, #tpu.memory_space<vmem>>, %arg7: memref<1x128xf32, #tpu.memory_space<vmem>>, %arg8: memref<8x128xf32, #tpu.memory_space<vmem>>) attributes {dimension_semantics = [#tpu.dimension_semantics<parallel>], iteration_bounds = array<i64: 1>, scalar_prefetch = 0 : i64, scratch_operands = 0 : i64, tpu.core_type = #tpu.core_type<tc>, window_params = [{transform_indices = @transform_0, window_bounds = array<i64: 8, 128>}, {pipeline_mode = #tpu.pipeline_mode<synchronous>, transform_indices = @transform_1, window_bounds = array<i64: 128, 128>}, {pipeline_mode = #tpu.pipeline_mode<synchronous>, transform_indices = @transform_2, window_bounds = array<i64: 1, 128>}, {pipeline_mode = #tpu.pipeline_mode<synchronous>, transform_indices = @transform_3, window_bounds = array<i64: 128, 128>}, {pipeline_mode = #tpu.pipeline_mode<synchronous>, transform_indices = @transform_4, window_bounds = array<i64: 1, 128>}, {pipeline_mode = #tpu.pipeline_mode<synchronous>, transform_indices = @transform_5, window_bounds = array<i64: 128, 128>}, {pipeline_mode = #tpu.pipeline_mode<synchronous>, transform_indices = @transform_6, window_bounds = array<i64: 1, 128>}, {transform_indices = @transform_7, window_bounds = array<i64: 8, 128>}]} {
    %c0 = arith.constant 0 : index
    %c0_0 = arith.constant 0 : index
    %0 = vector.load %arg1[%c0, %c0_0] : memref<8x128xbf16, #tpu.memory_space<vmem>>, vector<8x128xbf16>
    %c0_1 = arith.constant 0 : index
    %c0_2 = arith.constant 0 : index
    %1 = vector.load %arg2[%c0_1, %c0_2] : memref<128x128xbf16, #tpu.memory_space<vmem>>, vector<128x128xbf16>
    %cst = arith.constant dense<0.000000e+00> : vector<8x128xf32>
    %2 = tpu.matmul %0, %1, %cst {dimension_numbers = #tpu.dot_dimension_numbers<[1], [0], [0], [1], [0, 0, 1, 1], [], []>} : vector<8x128xbf16>, vector<128x128xbf16>, vector<8x128xf32> -> vector<8x128xf32>
    %c0_3 = arith.constant 0 : index
    %c0_4 = arith.constant 0 : index
    %3 = vector.load %arg3[%c0_3, %c0_4] : memref<1x128xf32, #tpu.memory_space<vmem>>, vector<1x128xf32>
    %4 = vector.broadcast %3 : vector<1x128xf32> to vector<8x128xf32>
    %5 = arith.addf %2, %4 : vector<8x128xf32>
    %6 = math.tanh %5 : vector<8x128xf32>
    %7 = arith.truncf %6 : vector<8x128xf32> to vector<8x128xbf16>
    %c0_5 = arith.constant 0 : index
    %c0_6 = arith.constant 0 : index
    %8 = vector.load %arg4[%c0_5, %c0_6] : memref<128x128xbf16, #tpu.memory_space<vmem>>, vector<128x128xbf16>
    %cst_7 = arith.constant dense<0.000000e+00> : vector<8x128xf32>
    %9 = tpu.matmul %7, %8, %cst_7 {dimension_numbers = #tpu.dot_dimension_numbers<[1], [0], [0], [1], [0, 0, 1, 1], [], []>} : vector<8x128xbf16>, vector<128x128xbf16>, vector<8x128xf32> -> vector<8x128xf32>
    %c0_8 = arith.constant 0 : index
    %c0_9 = arith.constant 0 : index
    %10 = vector.load %arg5[%c0_8, %c0_9] : memref<1x128xf32, #tpu.memory_space<vmem>>, vector<1x128xf32>
    %11 = vector.broadcast %10 : vector<1x128xf32> to vector<8x128xf32>
    %12 = arith.addf %9, %11 : vector<8x128xf32>
    %13 = math.tanh %12 : vector<8x128xf32>
    %14 = arith.truncf %13 : vector<8x128xf32> to vector<8x128xbf16>
    %c0_10 = arith.constant 0 : index
    %c0_11 = arith.constant 0 : index
    %15 = vector.load %arg6[%c0_10, %c0_11] : memref<128x128xbf16, #tpu.memory_space<vmem>>, vector<128x128xbf16>
    %cst_12 = arith.constant dense<0.000000e+00> : vector<8x128xf32>
    %16 = tpu.matmul %14, %15, %cst_12 {dimension_numbers = #tpu.dot_dimension_numbers<[1], [0], [0], [1], [0, 0, 1, 1], [], []>} : vector<8x128xbf16>, vector<128x128xbf16>, vector<8x128xf32> -> vector<8x128xf32>
    %c0_13 = arith.constant 0 : index
    %c0_14 = arith.constant 0 : index
    %17 = vector.load %arg7[%c0_13, %c0_14] : memref<1x128xf32, #tpu.memory_space<vmem>>, vector<1x128xf32>
    %18 = vector.broadcast %17 : vector<1x128xf32> to vector<8x128xf32>
    %19 = arith.addf %16, %18 : vector<8x128xf32>
    %c0_15 = arith.constant 0 : index
    %c0_16 = arith.constant 0 : index
    %20 = vector.load %arg8[%c0_15, %c0_16] : memref<8x128xf32, #tpu.memory_space<vmem>>, vector<8x128xf32>
    tpu.vector_store %arg8[%c0_15, %c0_16], %19 {strides = array<i32>} : memref<8x128xf32, #tpu.memory_space<vmem>>, vector<8x128xf32>,
    return
  }
  func.func @transform_0(%arg0: i32) -> (i32, i32) {
    %c0_i32 = arith.constant 0 : i32
    %c0_i32_0 = arith.constant 0 : i32
    return %arg0, %c0_i32 : i32, i32
  }
  func.func @transform_1(%arg0: i32) -> (i32, i32) {
    %c0_i32 = arith.constant 0 : i32
    %c0_i32_0 = arith.constant 0 : i32
    %c0_i32_1 = arith.constant 0 : i32
    return %c0_i32, %c0_i32_0 : i32, i32
  }
  func.func @transform_2(%arg0: i32) -> (i32, i32) {
    %c0_i32 = arith.constant 0 : i32
    %c0_i32_0 = arith.constant 0 : i32
    %c0_i32_1 = arith.constant 0 : i32
    return %c0_i32, %c0_i32_0 : i32, i32
  }
  func.func @transform_3(%arg0: i32) -> (i32, i32) {
    %c0_i32 = arith.constant 0 : i32
    %c0_i32_0 = arith.constant 0 : i32
    %c0_i32_1 = arith.constant 0 : i32
    return %c0_i32, %c0_i32_0 : i32, i32
  }
  func.func @transform_4(%arg0: i32) -> (i32, i32) {
    %c0_i32 = arith.constant 0 : i32
    %c0_i32_0 = arith.constant 0 : i32
    %c0_i32_1 = arith.constant 0 : i32
    return %c0_i32, %c0_i32_0 : i32, i32
  }
  func.func @transform_5(%arg0: i32) -> (i32, i32) {
    %c0_i32 = arith.constant 0 : i32
    %c0_i32_0 = arith.constant 0 : i32
    %c0_i32_1 = arith.constant 0 : i32
    return %c0_i32, %c0_i32_0 : i32, i32
  }
  func.func @transform_6(%arg0: i32) -> (i32, i32) {
    %c0_i32 = arith.constant 0 : i32
    %c0_i32_0 = arith.constant 0 : i32
    %c0_i32_1 = arith.constant 0 : i32
    return %c0_i32, %c0_i32_0 : i32, i32
  }
  func.func @transform_7(%arg0: i32) -> (i32, i32) {
    %c0_i32 = arith.constant 0 : i32
    %c0_i32_0 = arith.constant 0 : i32
    return %arg0, %c0_i32 : i32, i32
  }
}

</mosaic_0001>

<bundles_post_ra>
// kernel: dqn1_forward.1
= control target key start
LH: loop header
LB: loop body
LE: loop exit
PB: predicated region body
PF: predicated region fallthrough
CT: control target
= control target key end

     0   :  { %s533_s1 = inlined_call_operand.vmem [shape: bf16[128,128], index: 1, kind: input, shape index: {}]   ;;  %s534_s3 = inlined_call_operand.vmem [shape: bf16[128,128], index: 3, kind: input, shape index: {}]   ;;  %s535_s2 = inlined_call_operand.vmem [shape: f32[1,128], index: 2, kind: input, shape index: {}]   ;;  %s536_s0 = inlined_call_operand.vmem [shape: bf16[8,128], index: 0, kind: input, shape index: {}]   ;;  %s537_s4 = inlined_call_operand.vmem [shape: f32[1,128], index: 4, kind: input, shape index: {}]   ;;  %s538_s5 = inlined_call_operand.vmem [shape: bf16[128,128], index: 5, kind: input, shape index: {}]   ;;  %s539_s6 = inlined_call_operand.vmem [shape: f32[1,128], index: 6, kind: input, shape index: {}]   ;;  %s540_s7 = inlined_call_operand.vmem [shape: f32[8,128], index: 7, kind: output, shape index: {}]  }
   0x1   :  { %v382_v0 = vld [vmem:[%s533_s1 + $0x38] sm:$0xff]  ;;  %v381_v1 = vld [vmem:[%s533_s1 + $0x30] sm:$0xff]  ;;  %v380_v4 = vld [vmem:[%s533_s1 + $0x28] sm:$0xff] }
   0x2   :  { %95 = vmatpush.bf16.msra.mxu0 %v382_v0  ;;  %v390_v2 = vld [vmem:[%s534_s3 + $0x38] sm:$0xff]  ;;  %v389_v3 = vld [vmem:[%s534_s3 + $0x30] sm:$0xff]  ;;  %v388_v5 = vld [vmem:[%s534_s3 + $0x28] sm:$0xff] }
   0x3   :  { %178 = vmatpush.bf16.msra.mxu1 %v390_v2  ;;  %v379_v6 = vld [vmem:[%s533_s1 + $0x20] sm:$0xff]  ;;  %v378_v8 = vld [vmem:[%s533_s1 + $0x18] sm:$0xff]  ;;  %v377_v10 = vld [vmem:[%s533_s1 + $0x10] sm:$0xff] }
   0x4   :  { %v387_v7 = vld [vmem:[%s534_s3 + $0x20] sm:$0xff]  ;;  %v386_v9 = vld [vmem:[%s534_s3 + $0x18] sm:$0xff]  ;;  %v376_v11 = vld [vmem:[%s533_s1 + $0x8] sm:$0xff] }
   0x5   :  { %v375_v12 = vld [vmem:[%s533_s1] sm:$0xff]  ;;  %v385_v14 = vld [vmem:[%s534_s3 + $0x10] sm:$0xff]  ;;  %v384_v15 = vld [vmem:[%s534_s3 + $0x8] sm:$0xff] }
   0x6   :  { %96 = vmatpush.bf16.msra.mxu0 %v381_v1  ;;  %v26_v13 = vld [vmem:[%s536_s0] sm:$0xf]  ;;  %v398_v17 = vld [vmem:[%s538_s5 + $0x38] sm:$0xff]  ;;  %v397_v18 = vld [vmem:[%s538_s5 + $0x30] sm:$0xff] }
   0x7   :  { %179 = vmatpush.bf16.msra.mxu1 %v389_v3  ;;  %v383_v16 = vld [vmem:[%s534_s3] sm:$0xff]  ;;  %261 = vmatpush.bf16.msra.mxu2 %v398_v17  ;;  %v396_v19 = vld [vmem:[%s538_s5 + $0x28] sm:$0xff]  ;;  %v394_v21 = vld [vmem:[%s538_s5 + $0x18] sm:$0xff] }
   0x8   :  { %v395_v20 = vld [vmem:[%s538_s5 + $0x20] sm:$0xff]  ;;  %v393_v28 = vld [vmem:[%s538_s5 + $0x10] sm:$0xff]  ;;  %v392_v29 = vld [vmem:[%s538_s5 + $0x8] sm:$0xff] }
   0x9   :  { %v399_v22 = vld [vmem:[%s535_s2] ss:$0 sm:$0xff] }
   0xa   :  { %97 = vmatpush.bf16.msra.mxu0 %v380_v4  ;;  %v391_v30 = vld [vmem:[%s538_s5] sm:$0xff] }
   0xb   :  { %180 = vmatpush.bf16.msra.mxu1 %v388_v5  ;;  %262 = vmatpush.bf16.msra.mxu2 %v397_v18  ;;  %v400_v31 = vld [vmem:[%s537_s4] ss:$0 sm:$0xff] }
   0xc   :  { %v401_v37 = vld [vmem:[%s539_s6] ss:$0 sm:$0xff] }
   0xe   :  { %98 = vmatpush.bf16.msra.mxu0 %v379_v6 }
   0xf   :  { %181 = vmatpush.bf16.msra.mxu1 %v387_v7  ;;  %263 = vmatpush.bf16.msra.mxu2 %v396_v19 }
  0x12   :  { %99 = vmatpush.bf16.msra.mxu0 %v378_v8 }
  0x13   :  { %182 = vmatpush.bf16.msra.mxu1 %v386_v9  ;;  %264 = vmatpush.bf16.msra.mxu2 %v395_v20 }
  0x16   :  { %100 = vmatpush.bf16.msra.mxu0 %v377_v10 }
  0x17   :  { %183 = vmatpush.bf16.msra.mxu1 %v385_v14  ;;  %265 = vmatpush.bf16.msra.mxu2 %v394_v21 }
  0x1a   :  { %101 = vmatpush.bf16.msra.mxu0 %v376_v11 }
  0x1b   :  { %184 = vmatpush.bf16.msra.mxu1 %v384_v15  ;;  %266 = vmatpush.bf16.msra.mxu2 %v393_v28 }
  0x1e   :  { %102 = vmatpush.bf16.msra.mxu0 %v375_v12 }
  0x1f   :  { %185 = vmatpush.bf16.msra.mxu1 %v383_v16  ;;  %267 = vmatpush.bf16.msra.mxu2 %v392_v29 }
  0x21   :  { %103 = vmatmul.bf16.vlgmr.msra.gmra.mxu0 %v26_v13 }
  0x23   :  { %268 = vmatpush.bf16.msra.mxu2 %v391_v30 }
  0x9e   :  { %v104_v23 = vpop.f32.mrf.mxu0 }
  0x9f   :  { %v105_v24 = vadd.f32 %v399_v22, %v104_v23 }
  0xa1   :  { %402 = vtanh.f32 %v105_v24 }
  0xa6   :  { %v106_v25 = vpop.f32.mrf.mxu0 }
  0xa7   :  { %v403_v26 = vpop.eup %402 }
  0xa8   :  { %v109_v27 = vpack.c.bf16 %v403_v26, %v403_v26 }
  0xaa   :  { %186 = vmatmul.bf16.vlgmr.msra.gmra.mxu1 %v109_v27 }
 0x127   :  { %v187_v32 = vpop.f32.mrf.mxu1 }
 0x128   :  { %v188_v33 = vadd.f32 %v400_v31, %v187_v32 }
 0x12a   :  { %404 = vtanh.f32 %v188_v33 }
 0x12f   :  { %v189_v34 = vpop.f32.mrf.mxu1 }
 0x130   :  { %v405_v35 = vpop.eup %404 }
 0x131   :  { %v192_v36 = vpack.c.bf16 %v405_v35, %v405_v35 }
 0x133   :  { %269 = vmatmul.bf16.vlgmr.msra.gmra.mxu2 %v192_v36 }
 0x1b6   :  { %v270_v38 = vpop.f32.mrf.mxu2 }
 0x1b7   :  { %v271_v39 = vadd.f32 %v401_v37, %v270_v38 }
 0x1b9   :  { %274 = vst [vmem:[%s540_s7] sm:$0xff] %v271_v39 }
 0x1be   :  { %v272_v40 = vpop.f32.mrf.mxu2 }

</bundles_post_ra>
